<compile_context>
chip_gen: v7x
topology: tpu7x:2x2x1
jax: 0.10.0
libtpu: 0.0.40
codegen_flags: <defaults>
</compile_context>

<pallas_src>
import jax
import jax.numpy as jnp
from jax.experimental import pallas as pl
from jax.experimental.pallas import tpu as pltpu

INPUT_SIZE = 5
OUTPUT_SIZE = 1
TILE_B = 512          # lanes per grid step for large batches (512-1024 sweet spot)


def linear_kernel(w_ref, b_ref, x_ref, o_ref):
    """w_ref: SMEM (IN,) f32, b_ref: SMEM (1,) f32,
       x_ref: VMEM (IN, TB) f32 (batch on lanes), o_ref: VMEM (1, TB)."""
    # 5 VPU FMAs instead of an MXU pass; batch stays on lanes the whole time.
    acc = w_ref[0] * x_ref[pl.ds(0, 1), :]
    for k in range(1, INPUT_SIZE):                 # static unroll, IN = 5
        acc = acc + w_ref[k] * x_ref[pl.ds(k, 1), :]
    o_ref[...] = (acc + b_ref[0]).astype(o_ref.dtype)


def modelo_simples_forward(x, weight, bias, *, tile_b=TILE_B):
    """x: [B, IN] f32, weight: [OUT, IN] f32 (PyTorch layout), bias: [OUT] f32.
    Returns [B, OUT], numerically x @ weight.T + bias."""
    B = x.shape[0]

    # Layout plumbing only (not compute): batch on lanes, params as flat scalars.
    x_t = x.T                                      # [IN, B]
    w_flat = weight.reshape(INPUT_SIZE)            # OUT == 1 -> (IN,)
    b_flat = bias.reshape(OUTPUT_SIZE)             # (1,)

    if B <= tile_b:
        tb = B                                     # single full block
        b_pad = B
    else:
        tb = tile_b
        b_pad = pl.cdiv(B, tb) * tb
        if b_pad != B:
            x_t = jnp.pad(x_t, ((0, 0), (0, b_pad - B)))
    num_blocks = b_pad // tb

    out_t = pl.pallas_call(
        linear_kernel,
        out_shape=jax.ShapeDtypeStruct((1, b_pad), x.dtype),
        grid=(num_blocks,),
        in_specs=[
            # Params: whole-array SMEM residents (constant across grid steps).
            pl.BlockSpec(memory_space=pltpu.MemorySpace.SMEM),
            pl.BlockSpec(memory_space=pltpu.MemorySpace.SMEM),
            # Activations: lane-dense [IN, TB] tiles, double-buffered by Pallas.
            pl.BlockSpec((INPUT_SIZE, tb), lambda i: (0, i)),
        ],
        out_specs=pl.BlockSpec((1, tb), lambda i: (0, i)),
        compiler_params=pltpu.CompilerParams(
            dimension_semantics=("parallel",),     # megacore sharding on v7x
        ),
        cost_estimate=pl.CostEstimate(
            flops=2 * INPUT_SIZE * b_pad,
            transcendentals=0,
            bytes_accessed=(INPUT_SIZE * b_pad + b_pad + INPUT_SIZE + 1) * 4,
        ),
    )(w_flat, b_flat, x_t)

    # [1, B] (lane-dense) back to the module's [B, OUT] layout.
    return out_t[:, :B].reshape(B, OUTPUT_SIZE)


if __name__ == "__main__":
    key = jax.random.PRNGKey(0)
    kx, kw, kb, kx2 = jax.random.split(key, 4)

    # Deterministic parameter init (mimics nn.Linear uniform(-1/sqrt(in), 1/sqrt(in)))
    bound = 1.0 / (INPUT_SIZE ** 0.5)
    weight = jax.random.uniform(kw, (OUTPUT_SIZE, INPUT_SIZE),
                                minval=-bound, maxval=bound, dtype=jnp.float32)
    bias = jax.random.uniform(kb, (OUTPUT_SIZE,),
                              minval=-bound, maxval=bound, dtype=jnp.float32)

    # Small batch (single full block, grid=(1,)).
    batch = 8
    x = jax.random.normal(kx, (batch, INPUT_SIZE), dtype=jnp.float32)
    out = jax.block_until_ready(modelo_simples_forward(x, weight, bias))
    ref = x @ weight.T + bias
    assert out.shape == (batch, OUTPUT_SIZE)
    assert jnp.allclose(out, ref, atol=1e-5, rtol=1e-5)

    # Larger batch exercises the tiled path (2 grid steps + lane padding).
    batch2 = 1000
    x2 = jax.random.normal(kx2, (batch2, INPUT_SIZE), dtype=jnp.float32)
    out2 = jax.block_until_ready(modelo_simples_forward(x2, weight, bias))
    ref2 = x2 @ weight.T + bias
    assert out2.shape == (batch2, OUTPUT_SIZE)
    assert jnp.allclose(out2, ref2, atol=1e-5, rtol=1e-5)

    print("KERNEL_OK")
</pallas_src>

<mosaic_0001>
module attributes {stable_mosaic.version = 11 : i64} {
  func.func @linear_kernel(%arg0: i32, %arg1: memref<5xf32, #tpu.memory_space<smem>>, %arg2: memref<1xf32, #tpu.memory_space<smem>>, %arg3: memref<5x8xf32, #tpu.memory_space<vmem>>, %arg4: memref<1x8xf32, #tpu.memory_space<vmem>>) attributes {dimension_semantics = [#tpu.dimension_semantics<parallel>], iteration_bounds = array<i64: 1>, scalar_prefetch = 0 : i64, scratch_operands = 0 : i64, tpu.core_type = #tpu.core_type<tc>, window_params = [{transform_indices = @transform_0, window_bounds = array<i64: 5>}, {transform_indices = @transform_1, window_bounds = array<i64: 1>}, {transform_indices = @transform_2, window_bounds = array<i64: 5, 8>}, {transform_indices = @transform_3, window_bounds = array<i64: 1, 8>}]} {
    %c0 = arith.constant 0 : index
    %0 = memref.load %arg1[%c0] : memref<5xf32, #tpu.memory_space<smem>>
    %c0_0 = arith.constant 0 : index
    %c0_1 = arith.constant 0 : index
    %1 = vector.load %arg3[%c0_0, %c0_1] : memref<5x8xf32, #tpu.memory_space<vmem>>, vector<1x8xf32>
    %2 = vector.broadcast %0 : f32 to vector<1x8xf32>
    %3 = arith.mulf %2, %1 : vector<1x8xf32>
    %c1 = arith.constant 1 : index
    %4 = memref.load %arg1[%c1] : memref<5xf32, #tpu.memory_space<smem>>
    %c1_2 = arith.constant 1 : index
    %c0_3 = arith.constant 0 : index
    %5 = vector.load %arg3[%c1_2, %c0_3] : memref<5x8xf32, #tpu.memory_space<vmem>>, vector<1x8xf32>
    %6 = vector.broadcast %4 : f32 to vector<1x8xf32>
    %7 = arith.mulf %6, %5 : vector<1x8xf32>
    %8 = arith.addf %3, %7 : vector<1x8xf32>
    %c2 = arith.constant 2 : index
    %9 = memref.load %arg1[%c2] : memref<5xf32, #tpu.memory_space<smem>>
    %c2_4 = arith.constant 2 : index
    %c0_5 = arith.constant 0 : index
    %10 = vector.load %arg3[%c2_4, %c0_5] : memref<5x8xf32, #tpu.memory_space<vmem>>, vector<1x8xf32>
    %11 = vector.broadcast %9 : f32 to vector<1x8xf32>
    %12 = arith.mulf %11, %10 : vector<1x8xf32>
    %13 = arith.addf %8, %12 : vector<1x8xf32>
    %c3 = arith.constant 3 : index
    %14 = memref.load %arg1[%c3] : memref<5xf32, #tpu.memory_space<smem>>
    %c3_6 = arith.constant 3 : index
    %c0_7 = arith.constant 0 : index
    %15 = vector.load %arg3[%c3_6, %c0_7] : memref<5x8xf32, #tpu.memory_space<vmem>>, vector<1x8xf32>
    %16 = vector.broadcast %14 : f32 to vector<1x8xf32>
    %17 = arith.mulf %16, %15 : vector<1x8xf32>
    %18 = arith.addf %13, %17 : vector<1x8xf32>
    %c4 = arith.constant 4 : index
    %19 = memref.load %arg1[%c4] : memref<5xf32, #tpu.memory_space<smem>>
    %c4_8 = arith.constant 4 : index
    %c0_9 = arith.constant 0 : index
    %20 = vector.load %arg3[%c4_8, %c0_9] : memref<5x8xf32, #tpu.memory_space<vmem>>, vector<1x8xf32>
    %21 = vector.broadcast %19 : f32 to vector<1x8xf32>
    %22 = arith.mulf %21, %20 : vector<1x8xf32>
    %23 = arith.addf %18, %22 : vector<1x8xf32>
    %c0_10 = arith.constant 0 : index
    %24 = memref.load %arg2[%c0_10] : memref<1xf32, #tpu.memory_space<smem>>
    %25 = vector.broadcast %24 : f32 to vector<1x8xf32>
    %26 = arith.addf %23, %25 : vector<1x8xf32>
    %c0_11 = arith.constant 0 : index
    %c0_12 = arith.constant 0 : index
    %27 = vector.load %arg4[%c0_11, %c0_12] : memref<1x8xf32, #tpu.memory_space<vmem>>, vector<1x8xf32>
    tpu.vector_store %arg4[%c0_11, %c0_12], %26 {strides = array<i32>} : memref<1x8xf32, #tpu.memory_space<vmem>>, vector<1x8xf32>,
    return
  }
  func.func @transform_0(%arg0: i32) -> i32 {
    %c0_i32 = arith.constant 0 : i32
    %c0_i32_0 = arith.constant 0 : i32
    return %c0_i32 : i32
  }
  func.func @transform_1(%arg0: i32) -> i32 {
    %c0_i32 = arith.constant 0 : i32
    %c0_i32_0 = arith.constant 0 : i32
    return %c0_i32 : i32
  }
  func.func @transform_2(%arg0: i32) -> (i32, i32) {
    %c0_i32 = arith.constant 0 : i32
    %c0_i32_0 = arith.constant 0 : i32
    return %c0_i32, %arg0 : i32, i32
  }
  func.func @transform_3(%arg0: i32) -> (i32, i32) {
    %c0_i32 = arith.constant 0 : i32
    %c0_i32_0 = arith.constant 0 : i32
    return %c0_i32, %arg0 : i32, i32
  }
}

</mosaic_0001>

<bundles_post_ra>
// kernel: tpu_custom_call.1
= control target key start
LH: loop header
LB: loop body
LE: loop exit
PB: predicated region body
PF: predicated region fallthrough
CT: control target
= control target key end

     0   :  { %9 = vsyncpa [#allocation6], 0  ;;  %s208_s0 = inlined_call_operand.vmem [shape: f32[5], index: 0, kind: input, shape index: {}]   ;;  %s209_s1 = inlined_call_operand.<no memory space> [shape: f32[1], index: 1, kind: input, shape index: {}]   ;;  %s210_s2 = inlined_call_operand.hbm [shape: f32[5,8], index: 2, kind: input, shape index: {}]   ;;  %s211_s3 = inlined_call_operand.hbm [shape: f32[1,8], index: 3, kind: output, shape index: {}]  }
   0x1   :  { %10 = vsyncpa [#allocation4], 0 }
   0x2   :  { %11 = vsyncpa [#allocation5], 0  ;;  %s18_s14 = sshll.u32 %s208_s0, 4  ;;  %s19_s14 = int_to_ptr.vmem [resolvable:$true] %s18_s14 }
   0x3   :  { %s93_s15 = scalar_lea.vmem %s19_s14, 16  ;;  %p98_p1 = scmp.lt.s32.totalorder %s19_s14, %s19_s14 }
   0x4   :  { %p94_p0 = scmp.ne.s32.totalorder %s19_s14, %s93_s15  ;;  %p99_p2 = scmp.lt.s32.totalorder %s93_s15, %s93_s15 }
   0x6   :  { %p100_p3 = por %p99_p2, %p98_p1 }
   0x8   :  { %p101_p4 = pnand %p100_p3, %p94_p0 }
   0xa   :  { %104 = shalt.err (!%p101_p4)
}
   0xb   :  { %s155_s16 = smov [#allocation3]   ;;  %s156_s17 = smov [#allocation7]  }
   0xc   :  { %21 = dma.vmem_to_smem %s19_s14, 16, %s155_s16, [#allocation6]  }
   0xd   :  { %s30_s18 = sshll.u32 %s156_s17, 4  ;;  %s105_s21 = scalar_lea.hbm %s210_s2, 128  ;;  %s31_s18 = int_to_ptr.vmem [resolvable:$true] %s30_s18 }
   0xe   :  { %p106_p5 = scmp.ne.s32.totalorder %s210_s2, %s105_s21  ;;  %p109_p6 = scmp.lt.u32.totalorder %s105_s21, %s210_s2 }
  0x10   :  { %p111_p7 = pnand %p109_p6, %p106_p5 }
  0x12   :  { %114 = shalt.err (!%p111_p7)
}
  0x13   :  { %s115_s25 = scalar_lea.vmem %s31_s18, 128  ;;  %p120_p9 = scmp.lt.s32.totalorder %s31_s18, %s31_s18 }
  0x14   :  { %p116_p8 = scmp.ne.s32.totalorder %s31_s18, %s115_s25  ;;  %p121_p10 = scmp.lt.s32.totalorder %s115_s25, %s115_s25 }
  0x16   :  { %p122_p11 = por %p121_p10, %p120_p9 }
  0x18   :  { %p123_p12 = pnand %p122_p11, %p116_p8 }
  0x1a   :  { %126 = shalt.err (!%p123_p12)
}
  0x1b   :  { %33 = dma.hbm_to_vmem [thread:$0]  %s210_s2, 128, %s31_s18, [#allocation4]  }
  0x1c   :  { %149 = dma.done.wait [#allocation6], 16  }
  0x1d   :  { %150 = vsyncadd [#allocation6], 4294967280 }
  0x1e   :  { %151 = dma.done.wait [#allocation4], 128  }
  0x1f   :  { %152 = vsyncadd [#allocation4], 4294967168 }
  0x20   :  { %40 = sfence }
  0x21   :  { %s41_s28 = sld [smem:[#allocation3]]  ;;  %s86_s29 = sld [smem:[#allocation3 + $0x1]]  ;;  %v42_v0 = vld [vmem:[#allocation7] sm:$0x1]  ;;  %v46_v1 = vld [vmem:[#allocation7 + $0x1] sm:$0x1]  ;;  %v66_v18 = vstv %s209_s1 }
  0x22   :  { %s87_s30 = sld [smem:[#allocation3 + $0x2]]  ;;  %s88_s4 = sld [smem:[#allocation3 + $0x3]]  ;;  %v51_v2 = vld [vmem:[#allocation7 + $0x2] sm:$0x1]  ;;  %v56_v5 = vld [vmem:[#allocation7 + $0x3] sm:$0x1] }
  0x23   :  { %s89_s5 = sld [smem:[#allocation3 + $0x4]]  ;;  %v61_v11 = vld [vmem:[#allocation7 + $0x4] sm:$0x1]  ;;  %s157_s7 = smov [#allocation8]   ;;  %vm68_vm0 = vcmask 57344  }
  0x24   :  { %s76_s8 = sshll.u32 %s157_s7, 4  ;;  %s77_s8 = int_to_ptr.vmem [resolvable:$true] %s76_s8 }
  0x25   :  { %s127_s9 = scalar_lea.vmem %s77_s8, 16  ;;  %s131_s10 = scalar_lea.vmem %s77_s8, 32 }
  0x26   :  { %p128_p13 = scmp.ne.s32.totalorder %s77_s8, %s127_s9  ;;  %p132_p0 = scmp.lt.s32.totalorder %s77_s8, %s77_s8 }
  0x27   :  { %v43_v3 = vstv %s41_s28  ;;  %v47_v4 = vstv %s86_s29  ;;  %p133_p1 = scmp.lt.s32.totalorder %s131_s10, %s127_s9 }
  0x28   :  { %v44_v6 = vmul.f32 %v43_v3, %v42_v0  ;;  %v48_v7 = vmul.f32 %v47_v4, %v46_v1  ;;  %v52_v8 = vstv %s87_s30  ;;  %v57_v10 = vstv %s88_s4 }
  0x29   :  { %v53_v9 = vmul.f32 %v52_v8, %v51_v2  ;;  %v62_v12 = vstv %s89_s5  ;;  %v58_v14 = vmul.f32 %v57_v10, %v56_v5  ;;  %p134_p2 = por %p133_p1, %p132_p0 }
  0x2a   :  { %v49_v13 = vadd.f32 %v48_v7, %v44_v6  ;;  %v63_v16 = vmul.f32 %v62_v12, %v61_v11 }
  0x2b   :  { %p135_p3 = pnand %p134_p2, %p128_p13 }
  0x2c   :  { %v54_v15 = vadd.f32 %v53_v9, %v49_v13 }
  0x2e   :  { %v59_v17 = vadd.f32 %v58_v14, %v54_v15 }
  0x30   :  { %v64_v19 = vadd.f32 %v63_v16, %v59_v17 }
  0x32   :  { %v67_v20 = vadd.f32 %v66_v18, %v64_v19 }
  0x34   :  { %69 = vst.msk [vmem:[#allocation8] sm:$0x1] %vm68_vm0, %v67_v20 }
  0x35   :  { %138 = shalt.err (!%p135_p3)
}
  0x36   :  { %s139_s13 = scalar_lea.hbm %s211_s3, 16 }
  0x37   :  { %p140_p4 = scmp.ne.s32.totalorder %s211_s3, %s139_s13  ;;  %p143_p5 = scmp.lt.u32.totalorder %s139_s13, %s211_s3 }
  0x39   :  { %p145_p6 = pnand %p143_p5, %p140_p4 }
  0x3b   :  { %148 = shalt.err (!%p145_p6)
}
  0x3c   :  { %79 = dma.vmem_to_hbm [thread:$0]  %s77_s8, 16, %s211_s3, [#allocation5]  }
  0x3d   :  { %153 = dma.done.wait [#allocation5], 16  }
  0x3e   :  { %154 = vsyncadd [#allocation5], 4294967280 }
  0x3f   :  { %83 = vsyncpa [#allocation4], 1 }
  0x40   :  { %84 = vsyncpa [#allocation5], 1 }
  0x41   :  { %85 = vsyncpa [#allocation6], 1 }

</bundles_post_ra>
